<compile_context>
chip_gen: v7x
topology: tpu7x:2x2x1
jax: 0.10.0
libtpu: 0.0.40
codegen_flags: <defaults>
</compile_context>

<pallas_src>
import jax
import jax.numpy as jnp
from jax.experimental import pallas as pl
from jax.experimental.pallas import tpu as pltpu


# ----------------------------------------------------------------------------
# Bilinear interpolation matrix (PyTorch align_corners=False convention)
# ----------------------------------------------------------------------------
def _interp_matrix(out_size: int, in_size: int) -> jnp.ndarray:
    if out_size == in_size:
        return jnp.eye(out_size, dtype=jnp.float32)
    scale = in_size / out_size
    dst = jnp.arange(out_size, dtype=jnp.float32)
    src = jnp.maximum((dst + 0.5) * scale - 0.5, 0.0)
    i0 = jnp.clip(jnp.floor(src).astype(jnp.int32), 0, in_size - 1)
    frac = src - i0.astype(jnp.float32)
    i1 = jnp.minimum(i0 + 1, in_size - 1)
    rows = jnp.arange(out_size)
    m = jnp.zeros((out_size, in_size), jnp.float32)
    m = m.at[rows, i0].add(1.0 - frac)
    m = m.at[rows, i1].add(frac)
    return m


# ----------------------------------------------------------------------------
# Hardware probes (best-effort, safe fallbacks)
# ----------------------------------------------------------------------------
def _vmem_capacity_bytes() -> int:
    try:
        return int(pltpu.get_tpu_info().vmem_capacity_bytes)
    except Exception:
        return 64 * 1024 * 1024          # conservative (v7x-sized) fallback


def _num_tensorcores() -> int:
    try:
        dev = jax.local_devices()[0]
        for attr in ("num_cores", "core_count"):
            v = getattr(dev, attr, None)
            if isinstance(v, int) and v > 0:
                return v
    except Exception:
        pass
    return 1


# ----------------------------------------------------------------------------
# Partition heuristic: channels per chunk, sized to a VMEM budget.
# Tiles keep the full spatial axis in lanes; the row axis is cg*B.
# ----------------------------------------------------------------------------
def _choose_channel_chunk(B, C, HW, HWd, Dp, needs_up,
                          img_itemsize, w_itemsize, vmem_cap):
    budget = int(vmem_cap * 0.35)        # ~22 MiB on v7x, ~45 MiB on v5e/v6e
    legal = []
    for cg in range(C, 0, -1):
        if C % cg:
            continue
        rows = cg * B
        if rows % 8 and rows != C * B:        # sublane constraint on image/sq tiles
            continue
        if (cg * HW) % 8 and cg != C:         # sublane constraint on the W slab
            continue
        legal.append(cg)
    if not legal:
        legal = [C]
    for cg in legal:                          # largest chunk first
        tile = 2 * (cg * B * HW * img_itemsize        # orig (double-buffered)
                    + cg * B * HWd * img_itemsize     # down
                    + cg * HW * Dp * w_itemsize)      # W slab (bf16 stream)
        tile += HW * Dp * 4                           # per-channel f32 W slice
        if needs_up:
            tile += HWd * HW * 4                      # K, single-buffered
            tile += cg * B * HW * 4                   # upsampled slab (f32)
        tile += 2 * (2 * B * Dp * 4 + cg * B * 4)     # output blocks
        if tile <= budget:
            return cg
    # TODO(synk): HW / D axis tiling needed for very large images; fall back to
    # the smallest legal whole-channel chunk.
    return legal[-1]


# ----------------------------------------------------------------------------
# Fused kernel factory.  Grid = (parallel groups, channel chunks per group).
#   orig_ref : (cg*B, HW)   channel-major image rows
#   down_ref : (cg*B, HWd)
#   w_ref    : (cg*HW, Dp)  projection slab (may be bf16)
#   k_ref    : (HWd, HW)    per-channel bilinear operator (upsample path only)
#   eo_ref   : (1, B, Dp)   per-group partial  sum_f orig * W
#   ed_ref   : (1, B, Dp)   per-group partial  sum_f up   * W
#   sq_ref   : (cg*B, 1)    per-row sum of squared error (written once)
# ----------------------------------------------------------------------------
def _make_fused_kernel(B, cg, HW, needs_up):
    def kernel(*refs):
        if needs_up:
            orig_ref, down_ref, w_ref, k_ref, eo_ref, ed_ref, sq_ref = refs
        else:
            orig_ref, down_ref, w_ref, eo_ref, ed_ref, sq_ref = refs

        @pl.when(pl.program_id(1) == 0)
        def _():
            eo_ref[...] = jnp.zeros_like(eo_ref)
            ed_ref[...] = jnp.zeros_like(ed_ref)

        o = orig_ref[...].astype(jnp.float32)          # (cg*B, HW)
        d = down_ref[...].astype(jnp.float32)          # (cg*B, HWd)

        if needs_up:
            # Fused bilinear upsample: channels folded into the MXU M axis.
            u = jnp.dot(d, k_ref[...], preferred_element_type=jnp.float32)
        else:
            u = d

        diff = u - o                                   # (cg*B, HW)
        sq_ref[...] = jnp.sum(diff * diff, axis=-1, keepdims=True)

        # Surrogate caption-embedding projection: each channel's B rows hit
        # that channel's rows of the projection matrix.
        eo_acc = eo_ref[0]                             # (B, Dp)
        ed_acc = ed_ref[0]
        for c in range(cg):                            # static unroll
            w_c = w_ref[c * HW:(c + 1) * HW, :].astype(jnp.float32)   # (HW, Dp)
            o_c = o[c * B:(c + 1) * B, :]                              # (B, HW)
            u_c = u[c * B:(c + 1) * B, :]
            eo_acc = eo_acc + jnp.dot(o_c, w_c, preferred_element_type=jnp.float32)
            ed_acc = ed_acc + jnp.dot(u_c, w_c, preferred_element_type=jnp.float32)
        eo_ref[0] = eo_acc
        ed_ref[0] = ed_acc

    return kernel


# ----------------------------------------------------------------------------
# Forward-pass wrapper
# ----------------------------------------------------------------------------
def blip_clip_loss(original_img, downsampled_img, w_proj, object_mask=None):
    del object_mask  # not used by the loss math in the reference forward
    B, C, H, W = original_img.shape
    _, _, Hd, Wd = downsampled_img.shape
    HW, HWd = H * W, Hd * Wd
    F = C * HW
    D = w_proj.shape[1]
    needs_up = (Hd, Wd) != (H, W)

    # Lane-dense embedding width; zero-padded columns are harmless for the
    # cosine similarity (they contribute exactly zero to norms / dot products).
    Dp = max(128, ((D + 127) // 128) * 128)
    w2 = w_proj if Dp == D else jnp.pad(w_proj, ((0, 0), (0, Dp - D)))

    # Channel-major (C*B, spatial) views: row r = c*B + b.  One cheap layout
    # pass on the (small) images buys full-sublane kernel tiles everywhere.
    orig_cm = jnp.transpose(original_img.reshape(B, C, HW), (1, 0, 2)).reshape(C * B, HW)
    down_cm = jnp.transpose(downsampled_img.reshape(B, C, HWd), (1, 0, 2)).reshape(C * B, HWd)

    vmem_cap = _vmem_capacity_bytes()
    cg = _choose_channel_chunk(B, C, HW, HWd, Dp, needs_up,
                               img_itemsize=original_img.dtype.itemsize,
                               w_itemsize=w2.dtype.itemsize,
                               vmem_cap=vmem_cap)
    n_chunks = C // cg
    n_par = 2 if (_num_tensorcores() >= 2 and n_chunks >= 2 and n_chunks % 2 == 0) else 1
    kpg = n_chunks // n_par

    chunk_map = lambda g, k: (g * kpg + k, 0)

    in_specs = [
        pl.BlockSpec((cg * B, HW), chunk_map),         # original rows
        pl.BlockSpec((cg * B, HWd), chunk_map),        # downsampled rows
        pl.BlockSpec((cg * HW, Dp), chunk_map),        # projection slab (bf16)
    ]
    inputs = [orig_cm, down_cm, w2]
    if needs_up:
        ry = _interp_matrix(H, Hd)                     # (H, Hd)
        rx = _interp_matrix(W, Wd)                     # (W, Wd)
        kmat = jnp.kron(ry, rx).T                      # (HWd, HW) per-channel op
        # Grid-invariant operand -> single buffer (no re-DMA, half the VMEM).
        in_specs.append(pl.BlockSpec((HWd, HW), lambda g, k: (0, 0),
                                     pipeline_mode=pl.Buffered(1)))
        inputs.append(kmat)

    out_shape = (
        jax.ShapeDtypeStruct((n_par, B, Dp), jnp.float32),   # eo partials
        jax.ShapeDtypeStruct((n_par, B, Dp), jnp.float32),   # ed partials
        jax.ShapeDtypeStruct((C * B, 1), jnp.float32),       # per-row sq error
    )
    out_specs = (
        pl.BlockSpec((1, B, Dp), lambda g, k: (g, 0, 0)),
        pl.BlockSpec((1, B, Dp), lambda g, k: (g, 0, 0)),
        pl.BlockSpec((cg * B, 1), chunk_map),
    )

    eo_p, ed_p, sq_rows = pl.pallas_call(
        _make_fused_kernel(B, cg, HW, needs_up),
        out_shape=out_shape,
        grid=(n_par, kpg),
        in_specs=in_specs,
        out_specs=out_specs,
        compiler_params=pltpu.CompilerParams(
            dimension_semantics=("parallel", "arbitrary"),
            vmem_limit_bytes=int(vmem_cap * 0.8),
        ),
    )(*inputs)

    # Tiny finalize in plain JAX: combine partials, normalize, reduce.
    eo = jnp.sum(eo_p, axis=0)                                 # (B, Dp)
    ed = jnp.sum(ed_p, axis=0)                                 # (B, Dp)
    sq = jnp.sum(sq_rows[:, 0].reshape(C, B), axis=0)          # (B,)
    eo = eo * jax.lax.rsqrt(jnp.sum(eo * eo, axis=-1, keepdims=True))
    ed = ed * jax.lax.rsqrt(jnp.sum(ed * ed, axis=-1, keepdims=True))
    sim = jnp.sum(eo * ed, axis=-1)                            # (B,)
    mse = sq / float(F)
    return jnp.sum(mse * (1.0 - sim * sim)) / float(B)


# ----------------------------------------------------------------------------
# Pure-JAX reference (for correctness check)
# ----------------------------------------------------------------------------
def reference_loss(original_img, downsampled_img, w_proj):
    B, C, H, W = original_img.shape
    _, _, Hd, Wd = downsampled_img.shape
    if (Hd, Wd) != (H, W):
        ry = _interp_matrix(H, Hd)
        rx = _interp_matrix(W, Wd)
        up = jnp.einsum('oi,bcij,pj->bcop', ry,
                        downsampled_img.astype(jnp.float32), rx)
    else:
        up = downsampled_img.astype(jnp.float32)
    F = C * H * W
    o = original_img.reshape(B, F).astype(jnp.float32)
    u = up.reshape(B, F)
    w = w_proj.astype(jnp.float32)
    eo = o @ w
    ed = u @ w
    eo = eo / jnp.linalg.norm(eo, axis=-1, keepdims=True)
    ed = ed / jnp.linalg.norm(ed, axis=-1, keepdims=True)
    sim = jnp.sum(eo * ed, axis=-1)
    mse = jnp.mean((u - o) ** 2, axis=-1)
    return jnp.sum(mse * (1.0 - sim ** 2)) / B


if __name__ == "__main__":
    B, C, H, W = 2, 4, 16, 16
    Hd, Wd = 8, 8
    D = 32

    key = jax.random.PRNGKey(0)
    k1, k2, k3 = jax.random.split(key, 3)
    original_img = jax.random.uniform(k1, (B, C, H, W), jnp.float32)
    downsampled_img = jax.random.uniform(k2, (B, C, Hd, Wd), jnp.float32)

    # Deterministic surrogate "CLIP text projection" weights; stored bf16 so
    # the kernel streams W from HBM at half the bytes (accumulation stays f32).
    w_proj = (jax.random.normal(k3, (C * H * W, D), jnp.float32)
              / jnp.sqrt(float(C * H * W))).astype(jnp.bfloat16)

    loss_fn = jax.jit(blip_clip_loss)
    loss = jax.block_until_ready(loss_fn(original_img, downsampled_img, w_proj))

    ref = reference_loss(original_img, downsampled_img, w_proj)
    assert jnp.allclose(loss, ref, atol=1e-4, rtol=1e-3), (loss, ref)
    print("KERNEL_OK")
</pallas_src>

<mosaic_0001>
module attributes {stable_mosaic.version = 11 : i64} {
  func.func private @main(%arg0: i32) attributes {dimension_semantics = [#tpu.dimension_semantics<core_parallel>], iteration_bounds = array<i64: 2>, tpu.core_type = #tpu.core_type<sc_scalar_subcore>, window_params = []} {
    return
  }
}

module attributes {stable_mosaic.version = 11 : i64} {
  func.func private @main(%arg0: i32) attributes {dimension_semantics = [#tpu.dimension_semantics<core_parallel>], iteration_bounds = array<i64: 2>, tpu.core_type = #tpu.core_type<sc_scalar_subcore>, window_params = []} {
    return
  }
}

module attributes {stable_mosaic.version = 11 : i64} {
  func.func @kernel(%arg0: i32, %arg1: i32, %arg2: memref<8x256xf32, #tpu.memory_space<vmem>>, %arg3: memref<8x64xf32, #tpu.memory_space<vmem>>, %arg4: memref<1024x128xbf16, #tpu.memory_space<vmem>>, %arg5: memref<64x256xf32, #tpu.memory_space<vmem>>, %arg6: memref<1x2x128xf32, #tpu.memory_space<vmem>>, %arg7: memref<1x2x128xf32, #tpu.memory_space<vmem>>, %arg8: memref<8x1xf32, #tpu.memory_space<vmem>>) attributes {dimension_semantics = [#tpu.dimension_semantics<parallel>, #tpu.dimension_semantics<arbitrary>], iteration_bounds = array<i64: 1, 1>, scalar_prefetch = 0 : i64, scratch_operands = 0 : i64, tpu.core_type = #tpu.core_type<tc>, window_params = [{transform_indices = @transform_0, window_bounds = array<i64: 8, 256>}, {transform_indices = @transform_1, window_bounds = array<i64: 8, 64>}, {transform_indices = @transform_2, window_bounds = array<i64: 1024, 128>}, {pipeline_mode = #tpu.pipeline_mode<synchronous>, transform_indices = @transform_3, window_bounds = array<i64: 64, 256>}, {transform_indices = @transform_4, window_bounds = array<i64: 1, 2, 128>}, {transform_indices = @transform_5, window_bounds = array<i64: 1, 2, 128>}, {transform_indices = @transform_6, window_bounds = array<i64: 8, 1>}]} {
    %c0_i32 = arith.constant 0 : i32
    %0 = arith.cmpi eq, %arg1, %c0_i32 : i32
    %1 = arith.extui %0 : i1 to i32
    %c0_i32_0 = arith.constant 0 : i32
    %2 = arith.cmpi ne, %1, %c0_i32_0 : i32
    scf.if %2 {
      %cst_34 = arith.constant 0.000000e+00 : f32
      %54 = vector.broadcast %cst_34 : f32 to vector<1x2x128xf32>
      %c0_35 = arith.constant 0 : index
      %c0_36 = arith.constant 0 : index
      %c0_37 = arith.constant 0 : index
      %55 = vector.load %arg6[%c0_35, %c0_36, %c0_37] : memref<1x2x128xf32, #tpu.memory_space<vmem>>, vector<1x2x128xf32>
      tpu.vector_store %arg6[%c0_35, %c0_36, %c0_37], %54 {strides = array<i32>} : memref<1x2x128xf32, #tpu.memory_space<vmem>>, vector<1x2x128xf32>,
      %cst_38 = arith.constant 0.000000e+00 : f32
      %56 = vector.broadcast %cst_38 : f32 to vector<1x2x128xf32>
      %c0_39 = arith.constant 0 : index
      %c0_40 = arith.constant 0 : index
      %c0_41 = arith.constant 0 : index
      %57 = vector.load %arg7[%c0_39, %c0_40, %c0_41] : memref<1x2x128xf32, #tpu.memory_space<vmem>>, vector<1x2x128xf32>
      tpu.vector_store %arg7[%c0_39, %c0_40, %c0_41], %56 {strides = array<i32>} : memref<1x2x128xf32, #tpu.memory_space<vmem>>, vector<1x2x128xf32>,
    } else {
    }
    %c0 = arith.constant 0 : index
    %c0_1 = arith.constant 0 : index
    %3 = vector.load %arg2[%c0, %c0_1] : memref<8x256xf32, #tpu.memory_space<vmem>>, vector<8x256xf32>
    %c0_2 = arith.constant 0 : index
    %c0_3 = arith.constant 0 : index
    %4 = vector.load %arg3[%c0_2, %c0_3] : memref<8x64xf32, #tpu.memory_space<vmem>>, vector<8x64xf32>
    %c0_4 = arith.constant 0 : index
    %c0_5 = arith.constant 0 : index
    %5 = vector.load %arg5[%c0_4, %c0_5] : memref<64x256xf32, #tpu.memory_space<vmem>>, vector<64x256xf32>
    %cst = arith.constant dense<0.000000e+00> : vector<8x256xf32>
    %6 = tpu.matmul %4, %5, %cst {dimension_numbers = #tpu.dot_dimension_numbers<[1], [0], [0], [1], [0, 0, 1, 1], [], []>} : vector<8x64xf32>, vector<64x256xf32>, vector<8x256xf32> -> vector<8x256xf32>
    %7 = arith.subf %6, %3 : vector<8x256xf32>
    %8 = arith.mulf %7, %7 : vector<8x256xf32>
    %cst_6 = arith.constant dense<0.000000e+00> : vector<8xf32>
    %9 = vector.multi_reduction <add>, %8, %cst_6 [1] : vector<8x256xf32> to vector<8xf32>
    %10 = vector.shape_cast %9 : vector<8xf32> to vector<8x1xf32>
    %c0_7 = arith.constant 0 : index
    %c0_8 = arith.constant 0 : index
    %11 = vector.load %arg8[%c0_7, %c0_8] : memref<8x1xf32, #tpu.memory_space<vmem>>, vector<8x1xf32>
    tpu.vector_store %arg8[%c0_7, %c0_8], %10 {strides = array<i32>} : memref<8x1xf32, #tpu.memory_space<vmem>>, vector<8x1xf32>,
    %c0_9 = arith.constant 0 : index
    %c0_10 = arith.constant 0 : index
    %c0_11 = arith.constant 0 : index
    %12 = vector.load %arg6[%c0_9, %c0_10, %c0_11] : memref<1x2x128xf32, #tpu.memory_space<vmem>>, vector<1x2x128xf32>
    %13 = vector.shape_cast %12 : vector<1x2x128xf32> to vector<2x128xf32>
    %c0_12 = arith.constant 0 : index
    %c0_13 = arith.constant 0 : index
    %c0_14 = arith.constant 0 : index
    %14 = vector.load %arg7[%c0_12, %c0_13, %c0_14] : memref<1x2x128xf32, #tpu.memory_space<vmem>>, vector<1x2x128xf32>
    %15 = vector.shape_cast %14 : vector<1x2x128xf32> to vector<2x128xf32>
    %c0_15 = arith.constant 0 : index
    %c0_16 = arith.constant 0 : index
    %16 = vector.load %arg4[%c0_15, %c0_16] : memref<1024x128xbf16, #tpu.memory_space<vmem>>, vector<256x128xbf16>
    %17 = arith.extf %16 : vector<256x128xbf16> to vector<256x128xf32>
    %18 = vector.extract_strided_slice %3 {offsets = [0, 0], sizes = [2, 256], strides = [1, 1]} : vector<8x256xf32> to vector<2x256xf32>
    %19 = vector.extract_strided_slice %6 {offsets = [0, 0], sizes = [2, 256], strides = [1, 1]} : vector<8x256xf32> to vector<2x256xf32>
    %cst_17 = arith.constant dense<0.000000e+00> : vector<2x128xf32>
    %20 = tpu.matmul %18, %17, %cst_17 {dimension_numbers = #tpu.dot_dimension_numbers<[1], [0], [0], [1], [0, 0, 1, 1], [], []>} : vector<2x256xf32>, vector<256x128xf32>, vector<2x128xf32> -> vector<2x128xf32>
    %21 = arith.addf %13, %20 : vector<2x128xf32>
    %cst_18 = arith.constant dense<0.000000e+00> : vector<2x128xf32>
    %22 = tpu.matmul %19, %17, %cst_18 {dimension_numbers = #tpu.dot_dimension_numbers<[1], [0], [0], [1], [0, 0, 1, 1], [], []>} : vector<2x256xf32>, vector<256x128xf32>, vector<2x128xf32> -> vector<2x128xf32>
    %23 = arith.addf %15, %22 : vector<2x128xf32>
    %c256 = arith.constant 256 : index
    %c0_19 = arith.constant 0 : index
    %24 = vector.load %arg4[%c256, %c0_19] : memref<1024x128xbf16, #tpu.memory_space<vmem>>, vector<256x128xbf16>
    %25 = arith.extf %24 : vector<256x128xbf16> to vector<256x128xf32>
    %26 = vector.extract_strided_slice %3 {offsets = [2, 0], sizes = [2, 256], strides = [1, 1]} : vector<8x256xf32> to vector<2x256xf32>
    %27 = vector.extract_strided_slice %6 {offsets = [2, 0], sizes = [2, 256], strides = [1, 1]} : vector<8x256xf32> to vector<2x256xf32>
    %cst_20 = arith.constant dense<0.000000e+00> : vector<2x128xf32>
    %28 = tpu.matmul %26, %25, %cst_20 {dimension_numbers = #tpu.dot_dimension_numbers<[1], [0], [0], [1], [0, 0, 1, 1], [], []>} : vector<2x256xf32>, vector<256x128xf32>, vector<2x128xf32> -> vector<2x128xf32>
    %29 = arith.addf %21, %28 : vector<2x128xf32>
    %cst_21 = arith.constant dense<0.000000e+00> : vector<2x128xf32>
    %30 = tpu.matmul %27, %25, %cst_21 {dimension_numbers = #tpu.dot_dimension_numbers<[1], [0], [0], [1], [0, 0, 1, 1], [], []>} : vector<2x256xf32>, vector<256x128xf32>, vector<2x128xf32> -> vector<2x128xf32>
    %31 = arith.addf %23, %30 : vector<2x128xf32>
    %c512 = arith.constant 512 : index
    %c0_22 = arith.constant 0 : index
    %32 = vector.load %arg4[%c512, %c0_22] : memref<1024x128xbf16, #tpu.memory_space<vmem>>, vector<256x128xbf16>
    %33 = arith.extf %32 : vector<256x128xbf16> to vector<256x128xf32>
    %34 = vector.extract_strided_slice %3 {offsets = [4, 0], sizes = [2, 256], strides = [1, 1]} : vector<8x256xf32> to vector<2x256xf32>
    %35 = vector.extract_strided_slice %6 {offsets = [4, 0], sizes = [2, 256], strides = [1, 1]} : vector<8x256xf32> to vector<2x256xf32>
    %cst_23 = arith.constant dense<0.000000e+00> : vector<2x128xf32>
    %36 = tpu.matmul %34, %33, %cst_23 {dimension_numbers = #tpu.dot_dimension_numbers<[1], [0], [0], [1], [0, 0, 1, 1], [], []>} : vector<2x256xf32>, vector<256x128xf32>, vector<2x128xf32> -> vector<2x128xf32>
    %37 = arith.addf %29, %36 : vector<2x128xf32>
    %cst_24 = arith.constant dense<0.000000e+00> : vector<2x128xf32>
    %38 = tpu.matmul %35, %33, %cst_24 {dimension_numbers = #tpu.dot_dimension_numbers<[1], [0], [0], [1], [0, 0, 1, 1], [], []>} : vector<2x256xf32>, vector<256x128xf32>, vector<2x128xf32> -> vector<2x128xf32>
    %39 = arith.addf %31, %38 : vector<2x128xf32>
    %c768 = arith.constant 768 : index
    %c0_25 = arith.constant 0 : index
    %40 = vector.load %arg4[%c768, %c0_25] : memref<1024x128xbf16, #tpu.memory_space<vmem>>, vector<256x128xbf16>
    %41 = arith.extf %40 : vector<256x128xbf16> to vector<256x128xf32>
    %42 = vector.extract_strided_slice %3 {offsets = [6, 0], sizes = [2, 256], strides = [1, 1]} : vector<8x256xf32> to vector<2x256xf32>
    %43 = vector.extract_strided_slice %6 {offsets = [6, 0], sizes = [2, 256], strides = [1, 1]} : vector<8x256xf32> to vector<2x256xf32>
    %cst_26 = arith.constant dense<0.000000e+00> : vector<2x128xf32>
    %44 = tpu.matmul %42, %41, %cst_26 {dimension_numbers = #tpu.dot_dimension_numbers<[1], [0], [0], [1], [0, 0, 1, 1], [], []>} : vector<2x256xf32>, vector<256x128xf32>, vector<2x128xf32> -> vector<2x128xf32>
    %45 = arith.addf %37, %44 : vector<2x128xf32>
    %cst_27 = arith.constant dense<0.000000e+00> : vector<2x128xf32>
    %46 = tpu.matmul %43, %41, %cst_27 {dimension_numbers = #tpu.dot_dimension_numbers<[1], [0], [0], [1], [0, 0, 1, 1], [], []>} : vector<2x256xf32>, vector<256x128xf32>, vector<2x128xf32> -> vector<2x128xf32>
    %47 = arith.addf %39, %46 : vector<2x128xf32>
    %c0_28 = arith.constant 0 : index
    %c0_29 = arith.constant 0 : index
    %c0_30 = arith.constant 0 : index
    %48 = vector.load %arg6[%c0_28, %c0_29, %c0_30] : memref<1x2x128xf32, #tpu.memory_space<vmem>>, vector<1x2x128xf32>
    %49 = vector.shape_cast %48 : vector<1x2x128xf32> to vector<2x128xf32>
    %50 = vector.shape_cast %45 : vector<2x128xf32> to vector<1x2x128xf32>
    tpu.vector_store %arg6[%c0_28, %c0_29, %c0_30], %50 {strides = array<i32>} : memref<1x2x128xf32, #tpu.memory_space<vmem>>, vector<1x2x128xf32>,
    %c0_31 = arith.constant 0 : index
    %c0_32 = arith.constant 0 : index
    %c0_33 = arith.constant 0 : index
    %51 = vector.load %arg7[%c0_31, %c0_32, %c0_33] : memref<1x2x128xf32, #tpu.memory_space<vmem>>, vector<1x2x128xf32>
    %52 = vector.shape_cast %51 : vector<1x2x128xf32> to vector<2x128xf32>
    %53 = vector.shape_cast %47 : vector<2x128xf32> to vector<1x2x128xf32>
    tpu.vector_store %arg7[%c0_31, %c0_32, %c0_33], %53 {strides = array<i32>} : memref<1x2x128xf32, #tpu.memory_space<vmem>>, vector<1x2x128xf32>,
    return
  }
  func.func @transform_0(%arg0: i32, %arg1: i32) -> (i32, i32) {
    %c1_i32 = arith.constant 1 : i32
    %0 = arith.muli %arg0, %c1_i32 : i32
    %1 = arith.addi %0, %arg1 : i32
    %c0_i32 = arith.constant 0 : i32
    %c0_i32_0 = arith.constant 0 : i32
    return %1, %c0_i32 : i32, i32
  }
  func.func @transform_1(%arg0: i32, %arg1: i32) -> (i32, i32) {
    %c1_i32 = arith.constant 1 : i32
    %0 = arith.muli %arg0, %c1_i32 : i32
    %1 = arith.addi %0, %arg1 : i32
    %c0_i32 = arith.constant 0 : i32
    %c0_i32_0 = arith.constant 0 : i32
    return %1, %c0_i32 : i32, i32
  }
  func.func @transform_2(%arg0: i32, %arg1: i32) -> (i32, i32) {
    %c1_i32 = arith.constant 1 : i32
    %0 = arith.muli %arg0, %c1_i32 : i32
    %1 = arith.addi %0, %arg1 : i32
    %c0_i32 = arith.constant 0 : i32
    %c0_i32_0 = arith.constant 0 : i32
    return %1, %c0_i32 : i32, i32
  }
  func.func @transform_3(%arg0: i32, %arg1: i32) -> (i32, i32) {
    %c0_i32 = arith.constant 0 : i32
    %c0_i32_0 = arith.constant 0 : i32
    %c0_i32_1 = arith.constant 0 : i32
    return %c0_i32, %c0_i32_0 : i32, i32
  }
  func.func @transform_4(%arg0: i32, %arg1: i32) -> (i32, i32, i32) {
    %c0_i32 = arith.constant 0 : i32
    %c0_i32_0 = arith.constant 0 : i32
    %c0_i32_1 = arith.constant 0 : i32
    return %arg0, %c0_i32, %c0_i32_0 : i32, i32, i32
  }
  func.func @transform_5(%arg0: i32, %arg1: i32) -> (i32, i32, i32) {
    %c0_i32 = arith.constant 0 : i32
    %c0_i32_0 = arith.constant 0 : i32
    %c0_i32_1 = arith.constant 0 : i32
    return %arg0, %c0_i32, %c0_i32_0 : i32, i32, i32
  }
  func.func @transform_6(%arg0: i32, %arg1: i32) -> (i32, i32) {
    %c1_i32 = arith.constant 1 : i32
    %0 = arith.muli %arg0, %c1_i32 : i32
    %1 = arith.addi %0, %arg1 : i32
    %c0_i32 = arith.constant 0 : i32
    %c0_i32_0 = arith.constant 0 : i32
    return %1, %c0_i32 : i32, i32
  }
}

</mosaic_0001>

<bundles_post_ra>
// kernel: squeeze.1
= control target key start
LH: loop header
LB: loop body
LE: loop exit
PB: predicated region body
PF: predicated region fallthrough
CT: control target
= control target key end

     0   :  { %s37_s8 = smov 122   ;;  %vm7_vm0 = vcmask 15360   ;;  %s38_s9 = smov 124   ;;  %s55_s0 = inlined_call_operand.vmem [shape: f32[8], index: 0, kind: input, shape index: {}]   ;;  %s56_s1 = inlined_call_operand.vmem [shape: f32[4,2], index: 1, kind: output, shape index: {}]  }
   0x1   :  { %v4_v0 = vld [vmem:[%s55_s0] sm:$0x1]  ;;  %s36_s0 = smov 126  }
   0x2   :  { %5 = vst [vmem:[#allocation1] sm:$0x1] %v4_v0 }
   0x9   :  { %v9_v1 = vld [vmem:[#allocation1] sm:$0x1]  }
   0xa   :  { %v21_v2 = vld [vmem:[#allocation1] sm:$0x1]   ;;  %10 = vrot.lane.b32.xlu0 %v9_v1, %s36_s0 }
   0xb   :  { %22 = vrot.lane.b32.xlu1 %v21_v2, %s37_s8  ;;  %v6_v3 = vld [vmem:[#allocation1] sm:$0x1]  }
   0xc   :  { %v15_v4 = vld [vmem:[#allocation1] sm:$0x1]   ;;  %8 = vst.msk [vmem:[#allocation0] sm:$0x1] %vm7_vm0, %v6_v3  }
   0xe   :  { %16 = vrot.lane.b32.xlu0 %v15_v4, %s38_s9 }
  0x7c   :  { %v11_v5 = vpop.permute.xlu0 %10  }
  0x7d   :  { %v23_v6 = vpop.permute.xlu1 %22   ;;  %14 = vst.msk [vmem:[#allocation0 + $0x1] sm:$0x1] %vm7_vm0, %v11_v5  }
  0x7e   :  { %26 = vst.msk [vmem:[#allocation0 + $0x3] sm:$0x1] %vm7_vm0, %v23_v6  }
  0x80   :  { %v17_v7 = vpop.permute.xlu0 %16  }
  0x81   :  { %20 = vst.msk [vmem:[#allocation0 + $0x2] sm:$0x1] %vm7_vm0, %v17_v7  }
  0x88   :  { %v30_v8 = vld [vmem:[#allocation0] sm:$0xf] }
  0x89   :  { %32 = vst [vmem:[%s56_s1] sm:$0xf] %v30_v8 }

// kernel: blip_clip_loss.1
= control target key start
LH: loop header
LB: loop body
LE: loop exit
PB: predicated region body
PF: predicated region fallthrough
CT: control target
= control target key end

     0   :  { %v1977_v3 = vmov 0.0   ;;  %vm115_vm0 = vcmask 523264   ;;  %vm197_vm1 = vcmask 7168   ;;  %s2492_s3 = inlined_call_operand.vmem [shape: f32[64,256], index: 3, kind: input, shape index: {}]   ;;  %s2493_s4 = inlined_call_operand.vmem [shape: f32[1,2,128], index: 4, kind: output, shape index: {0}]   ;;  %s2494_s5 = inlined_call_operand.vmem [shape: f32[1,2,128], index: 5, kind: output, shape index: {1}]   ;;  %s2495_s2 = inlined_call_operand.vmem [shape: bf16[1024,128], index: 2, kind: input, shape index: {}]   ;;  %s2496_s0 = inlined_call_operand.vmem [shape: f32[8,256], index: 0, kind: input, shape index: {}]   ;;  %s2497_s1 = inlined_call_operand.vmem [shape: f32[8,64], index: 1, kind: input, shape index: {}]   ;;  %s2498_s6 = inlined_call_operand.vmem [shape: f32[8,1], index: 6, kind: output, shape index: {2}]  }
   0x1   :  { %v100_v0 = vld [vmem:[%s2492_s3 + $0x8] sm:$0xff]  ;;  %v102_v1 = vld [vmem:[%s2492_s3 + $0x18] sm:$0xff]  ;;  %v99_v2 = vld [vmem:[%s2492_s3] sm:$0xff]  ;;  %94 = vst [vmem:[%s2493_s4] sm:$0x3] %v1977_v3  ;;  %183 = vmatprep.mubr.f32.mxu0 %v1977_v3 }
   0x2   :  { %95 = vst [vmem:[%s2494_s5] sm:$0x3] %v1977_v3  ;;  %v1704_v4 = vpack.c.bf16 %v102_v1, %v100_v0  ;;  %v101_v5 = vld [vmem:[%s2492_s3 + $0x10] sm:$0xff]  ;;  %v104_v6 = vld [vmem:[%s2492_s3 + $0x28] sm:$0xff]  ;;  %v106_v7 = vld [vmem:[%s2492_s3 + $0x38] sm:$0xff] }
   0x3   :  { %v1706_v8 = vpack.c.bf16 %v101_v5, %v99_v2  ;;  %v1708_v9 = vpack.c.bf16 %v106_v7, %v104_v6  ;;  %v103_v10 = vld [vmem:[%s2492_s3 + $0x20] sm:$0xff]  ;;  %v105_v11 = vld [vmem:[%s2492_s3 + $0x30] sm:$0xff]  ;;  %v108_v12 = vld [vmem:[%s2492_s3 + $0x48] sm:$0xff] }
   0x4   :  { %1705 = vmatprep.subr.bf16.mxu0 %v1704_v4  ;;  %v110_v13 = vld [vmem:[%s2492_s3 + $0x58] sm:$0xff]  ;;  %v1710_v14 = vpack.c.bf16 %v105_v11, %v103_v10  ;;  %v107_v15 = vld [vmem:[%s2492_s3 + $0x40] sm:$0xff]  ;;  %v109_v17 = vld [vmem:[%s2492_s3 + $0x50] sm:$0xff] }
   0x5   :  { %1707 = vmatpush1.bf16.msra.mxu0 %v1706_v8  ;;  %v1712_v16 = vpack.c.bf16 %v110_v13, %v108_v12  ;;  %v112_v18 = vld [vmem:[%s2492_s3 + $0x68] sm:$0xff]  ;;  %v1368_v19 = vld [vmem:[%s2495_s2 + $0x40] sm:$0xff]   ;;  %v114_v20 = vld [vmem:[%s2492_s3 + $0x78] sm:$0xff]  ;;  %v1714_v23 = vpack.c.bf16 %v109_v17, %v107_v15 }
   0x6   :  { %1709 = vmatprep.subr.bf16.mxu0 %v1708_v9  ;;  %1721 = vmatprep.subr.bf16.mxu1 %v1368_v19  ;;  %v1106_v21 = vld [vmem:[%s2495_s2] sm:$0xff]   ;;  %v1369_v22 = vld [vmem:[%s2495_s2 + $0x48] sm:$0xff]   ;;  %v1716_v25 = vpack.c.bf16 %v114_v20, %v112_v18  ;;  %v113_v27 = vld [vmem:[%s2492_s3 + $0x70] sm:$0xff] }
   0x7   :  { %1723 = vmatpush3.bf16.msra.mxu1 %v1106_v21  ;;  %v1361_v24 = vld [vmem:[%s2495_s2 + $0x8] sm:$0xff]   ;;  %v111_v26 = vld [vmem:[%s2492_s3 + $0x60] sm:$0xff]  ;;  %v1370_v28 = vld [vmem:[%s2495_s2 + $0x50] sm:$0xff]  }
   0x8   :  { %1725 = vmatprep.subr.bf16.mxu1 %v1369_v22  ;;  %v2085_v29 = vld [vmem:[%s2496_s0 + $0x8] sm:$0xff]  ;;  %v1718_v30 = vpack.c.bf16 %v113_v27, %v111_v26  ;;  %v1362_v31 = vld [vmem:[%s2495_s2 + $0x10] sm:$0xff]   ;;  %v1371_v32 = vld [vmem:[%s2495_s2 + $0x58] sm:$0xff]  }
   0x9   :  { %1711 = vmatpush1.bf16.msra.mxu0 %v1710_v14  ;;  %329 = vmatprep.mubr.f32.mxu1 %v2085_v29  ;;  %v98_v33 = vld [vmem:[%s2497_s1] sm:$0xff]  ;;  %v1363_v34 = vld [vmem:[%s2495_s2 + $0x18] sm:$0xff]   ;;  %v1373_v37 = vld [vmem:[%s2495_s2 + $0x68] sm:$0xff]   ;;  %v474_v45 = vrot.slane %v2085_v29, 2  ;;  %v690_v63 = vrot.slane %v2085_v29, 4 }
   0xa   :  { %1713 = vmatprep.subr.bf16.mxu0 %v1712_v16  ;;  %v1372_v35 = vld [vmem:[%s2495_s2 + $0x60] sm:$0xff]   ;;  %v1365_v38 = vld [vmem:[%s2495_s2 + $0x28] sm:$0xff]   ;;  %v1374_v39 = vld [vmem:[%s2495_s2 + $0x70] sm:$0xff]  }
   0xb   :  { %1727 = vmatpush3.bf16.msra.mxu1 %v1361_v24  ;;  %v1364_v36 = vld [vmem:[%s2495_s2 + $0x20] sm:$0xff]   ;;  %v1366_v40 = vld [vmem:[%s2495_s2 + $0x30] sm:$0xff]   ;;  %v1375_v41 = vld [vmem:[%s2495_s2 + $0x78] sm:$0xff]  }
   0xc   :  { %1729 = vmatprep.subr.bf16.mxu1 %v1370_v28  ;;  %v1367_v42 = vld [vmem:[%s2495_s2 + $0x38] sm:$0xff]   ;;  %v1384_v43 = vld [vmem:[%s2495_s2 + $0xc0] sm:$0xff]   ;;  %v2141_v47 = vld [vmem:[%s2495_s2 + $0xc8] sm:$0xff]  }
   0xd   :  { %1715 = vmatpush1.bf16.msra.mxu0 %v1714_v23  ;;  %v2130_v44 = vld [vmem:[%s2496_s0] sm:$0xff]  ;;  %v2149_v48 = vld [vmem:[%s2495_s2 + $0x88] sm:$0xff]   ;;  %v2154_v49 = vld [vmem:[%s2495_s2 + $0xd0] sm:$0xff]  }
   0xe   :  { %1717 = vmatprep.subr.bf16.mxu0 %v1716_v25  ;;  %v2136_v46 = vld [vmem:[%s2495_s2 + $0x80] sm:$0xff]   ;;  %v2161_v50 = vld [vmem:[%s2495_s2 + $0x90] sm:$0xff]   ;;  %v2166_v51 = vld [vmem:[%s2495_s2 + $0xd8] sm:$0xff]   ;;  %v473_v62 = vrot.slane %v2130_v44, 2  ;;  %v689_v16 = vrot.slane %v2130_v44, 4 }
   0xf   :  { %1731 = vmatpush3.bf16.msra.mxu1 %v1362_v31  ;;  %v2173_v52 = vld [vmem:[%s2495_s2 + $0x98] sm:$0xff]   ;;  %v2178_v53 = vld [vmem:[%s2495_s2 + $0xe0] sm:$0xff]   ;;  %v2190_v55 = vld [vmem:[%s2495_s2 + $0xe8] sm:$0xff]  }
  0x10   :  { %1733 = vmatprep.subr.bf16.mxu1 %v1371_v32  ;;  %v2185_v54 = vld [vmem:[%s2495_s2 + $0xa0] sm:$0xff]   ;;  %v2197_v56 = vld [vmem:[%s2495_s2 + $0xa8] sm:$0xff]   ;;  %v2202_v57 = vld [vmem:[%s2495_s2 + $0xf0] sm:$0xff]  }
  0x11   :  { %1719 = vmatpush1.bf16.msra.mxu0 %v1718_v30  ;;  %v2209_v58 = vld [vmem:[%s2495_s2 + $0xb0] sm:$0xff]   ;;  %v2214_v59 = vld [vmem:[%s2495_s2 + $0xf8] sm:$0xff]   ;;  %v2226_v61 = vld [vmem:[%s2495_s2 + $0x140] sm:$0xff]  }
  0x12   :  { %1753 = vmatprep.subr.bf16.mxu0 %v1368_v19  ;;  %v2221_v60 = vld [vmem:[%s2495_s2 + $0xb8] sm:$0xff]   ;;  %v2235_v0 = vld [vmem:[%s2495_s2 + $0x100] sm:$0xff]   ;;  %v2240_v1 = vld [vmem:[%s2495_s2 + $0x148] sm:$0xff]  }
  0x13   :  { %1735 = vmatpush3.bf16.msra.mxu1 %v1363_v34  ;;  %v2247_v2 = vld [vmem:[%s2495_s2 + $0x108] sm:$0xff]   ;;  %v2252_v3 = vld [vmem:[%s2495_s2 + $0x150] sm:$0xff]   ;;  %v2264_v5 = vld [vmem:[%s2495_s2 + $0x158] sm:$0xff]  }
  0x14   :  { %1104 = vmatmul.mubr.msk.f32.vlgmr.msra.gmra.mrb[0].mxu0 %vm115_vm0, %v98_v33  ;;  %1737 = vmatprep.subr.bf16.mxu1 %v1372_v35  ;;  %v2259_v4 = vld [vmem:[%s2495_s2 + $0x110] sm:$0xff]   ;;  %v2271_v6 = vld [vmem:[%s2495_s2 + $0x118] sm:$0xff]   ;;  %v2276_v7 = vld [vmem:[%s2495_s2 + $0x160] sm:$0xff]  }
  0x15   :  { %1755 = vmatpush3.bf16.msra.mxu0 %v1106_v21  ;;  %v2283_v8 = vld [vmem:[%s2495_s2 + $0x120] sm:$0xff]   ;;  %v2288_v9 = vld [vmem:[%s2495_s2 + $0x168] sm:$0xff]   ;;  %v2300_v11 = vld [vmem:[%s2495_s2 + $0x170] sm:$0xff]  }
  0x16   :  { %1757 = vmatprep.subr.bf16.mxu0 %v1369_v22  ;;  %v2295_v10 = vld [vmem:[%s2495_s2 + $0x128] sm:$0xff]   ;;  %v2307_v12 = vld [vmem:[%s2495_s2 + $0x130] sm:$0xff]   ;;  %v2312_v13 = vld [vmem:[%s2495_s2 + $0x178] sm:$0xff]   ;;  %v904_v22 = vrot.slane %v2085_v29, 6 }
  0x17   :  { %1739 = vmatpush3.bf16.msra.mxu1 %v1364_v36  ;;  %v2319_v14 = vld [vmem:[%s2495_s2 + $0x138] sm:$0xff]   ;;  %v2324_v15 = vld [vmem:[%s2495_s2 + $0x1c0] sm:$0xff]   ;;  %v2337_v18 = vld [vmem:[%s2495_s2 + $0x1c8] sm:$0xff]  }
  0x18   :  { %1741 = vmatprep.subr.bf16.mxu1 %v1373_v37  ;;  %v2332_v17 = vld [vmem:[%s2495_s2 + $0x180] sm:$0xff]   ;;  %v2344_v19 = vld [vmem:[%s2495_s2 + $0x188] sm:$0xff]   ;;  %v2349_v20 = vld [vmem:[%s2495_s2 + $0x1d0] sm:$0xff]  }
  0x19   :  { %1759 = vmatpush3.bf16.msra.mxu0 %v1361_v24  ;;  %v2356_v21 = vld [vmem:[%s2495_s2 + $0x190] sm:$0xff]   ;;  %v2362_v23 = vld [vmem:[%s2495_s2 + $0x1d8] sm:$0xff]   ;;  %v2374_v25 = vld [vmem:[%s2495_s2 + $0x1e0] sm:$0xff]  }
  0x1a   :  { %1761 = vmatprep.subr.bf16.mxu0 %v1370_v28  ;;  %v2369_v24 = vld [vmem:[%s2495_s2 + $0x198] sm:$0xff]   ;;  %v2381_v26 = vld [vmem:[%s2495_s2 + $0x1a0] sm:$0xff]   ;;  %v2386_v27 = vld [vmem:[%s2495_s2 + $0x1e8] sm:$0xff]  }
  0x1b   :  { %1743 = vmatpush3.bf16.msra.mxu1 %v1365_v38  ;;  %v2393_v28 = vld [vmem:[%s2495_s2 + $0x1a8] sm:$0xff]   ;;  %v2398_v30 = vld [vmem:[%s2495_s2 + $0x1f0] sm:$0xff]   ;;  %v2417_v33 = vld [vmem:[%s2495_s2 + $0x1b8] sm:$0xff]  }
  0x1c   :  { %1745 = vmatprep.subr.bf16.mxu1 %v1374_v39 }
  0x1d   :  { %1763 = vmatpush3.bf16.msra.mxu0 %v1362_v31  ;;  %v2405_v31 = vld [vmem:[%s2495_s2 + $0x1b0] sm:$0xff]  }
  0x1e   :  { %1765 = vmatprep.subr.bf16.mxu0 %v1371_v32  ;;  %v2410_v32 = vld [vmem:[%s2495_s2 + $0x1f8] sm:$0xff]  }
  0x1f   :  { %1747 = vmatpush3.bf16.msra.mxu1 %v1366_v40 }
  0x20   :  { %1749 = vmatprep.subr.bf16.mxu1 %v1375_v41 }
  0x21   :  { %1767 = vmatpush3.bf16.msra.mxu0 %v1363_v34  ;;  %v903_v34 = vrot.slane %v2130_v44, 6 }
  0x22   :  { %1769 = vmatprep.subr.bf16.mxu0 %v1372_v35 }
  0x23   :  { %1751 = vmatpush3.bf16.msra.mxu1 %v1367_v42 }
  0x24   :  { %1785 = vmatprep.subr.bf16.mxu1 %v1384_v43 }
  0x25   :  { %1771 = vmatpush3.bf16.msra.mxu0 %v1364_v36 }
  0x26   :  { %1773 = vmatprep.subr.bf16.mxu0 %v1373_v37  ;;  %330 = vmatmul.mubr.f32.vlgmr.msra.gmra.mrb[0].mxu1 %v2130_v44 }
  0x27   :  { %1787 = vmatpush3.bf16.msra.mxu1 %v2136_v46  ;;  %541 = vmatprep.mubr.f32.mxu1 %v474_v45 }
  0x28   :  { %1789 = vmatprep.subr.bf16.mxu1 %v2141_v47 }
  0x29   :  { %1775 = vmatpush3.bf16.msra.mxu0 %v1365_v38 }
  0x2a   :  { %1777 = vmatprep.subr.bf16.mxu0 %v1374_v39 }
  0x2b   :  { %1791 = vmatpush3.bf16.msra.mxu1 %v2149_v48 }
  0x2c   :  { %1793 = vmatprep.subr.bf16.mxu1 %v2154_v49 }
  0x2d   :  { %1779 = vmatpush3.bf16.msra.mxu0 %v1366_v40 }
  0x2e   :  { %1781 = vmatprep.subr.bf16.mxu0 %v1375_v41 }
  0x2f   :  { %1795 = vmatpush3.bf16.msra.mxu1 %v2161_v50 }
  0x30   :  { %1797 = vmatprep.subr.bf16.mxu1 %v2166_v51 }
  0x31   :  { %1783 = vmatpush3.bf16.msra.mxu0 %v1367_v42 }
  0x32   :  { %1817 = vmatprep.subr.bf16.mxu0 %v1384_v43 }
  0x33   :  { %1799 = vmatpush3.bf16.msra.mxu1 %v2173_v52 }
  0x34   :  { %1801 = vmatprep.subr.bf16.mxu1 %v2178_v53 }
  0x37   :  { %1803 = vmatpush3.bf16.msra.mxu1 %v2185_v54 }
  0x38   :  { %1805 = vmatprep.subr.bf16.mxu1 %v2190_v55 }
  0x3b   :  { %1807 = vmatpush3.bf16.msra.mxu1 %v2197_v56 }
  0x3c   :  { %1809 = vmatprep.subr.bf16.mxu1 %v2202_v57 }
  0x3f   :  { %1811 = vmatpush3.bf16.msra.mxu1 %v2209_v58 }
  0x40   :  { %1813 = vmatprep.subr.bf16.mxu1 %v2214_v59 }
  0x43   :  { %1815 = vmatpush3.bf16.msra.mxu1 %v2221_v60 }
  0x44   :  { %1849 = vmatprep.subr.bf16.mxu1 %v2226_v61 }
  0x46   :  { %542 = vmatmul.mubr.f32.vlgmr.msra.gmra.mrb[2].mxu1 %v473_v62 }
  0x47   :  { %1851 = vmatpush3.bf16.msra.mxu1 %v2235_v0  ;;  %757 = vmatprep.mubr.f32.mxu1 %v690_v63 }
  0x48   :  { %1853 = vmatprep.subr.bf16.mxu1 %v2240_v1 }
  0x4b   :  { %1855 = vmatpush3.bf16.msra.mxu1 %v2247_v2 }
  0x4c   :  { %1857 = vmatprep.subr.bf16.mxu1 %v2252_v3 }
  0x4f   :  { %1859 = vmatpush3.bf16.msra.mxu1 %v2259_v4 }
  0x50   :  { %1861 = vmatprep.subr.bf16.mxu1 %v2264_v5 }
  0x53   :  { %1863 = vmatpush3.bf16.msra.mxu1 %v2271_v6 }
  0x54   :  { %1865 = vmatprep.subr.bf16.mxu1 %v2276_v7 }
  0x57   :  { %1867 = vmatpush3.bf16.msra.mxu1 %v2283_v8 }
  0x58   :  { %1869 = vmatprep.subr.bf16.mxu1 %v2288_v9 }
  0x5b   :  { %1871 = vmatpush3.bf16.msra.mxu1 %v2295_v10 }
  0x5c   :  { %1873 = vmatprep.subr.bf16.mxu1 %v2300_v11 }
  0x5f   :  { %1875 = vmatpush3.bf16.msra.mxu1 %v2307_v12 }
  0x60   :  { %1877 = vmatprep.subr.bf16.mxu1 %v2312_v13 }
  0x63   :  { %1879 = vmatpush3.bf16.msra.mxu1 %v2319_v14 }
  0x64   :  { %1913 = vmatprep.subr.bf16.mxu1 %v2324_v15 }
  0x66   :  { %758 = vmatmul.mubr.f32.vlgmr.msra.gmra.mrb[4].mxu1 %v689_v16 }
  0x67   :  { %1915 = vmatpush3.bf16.msra.mxu1 %v2332_v17  ;;  %971 = vmatprep.mubr.f32.mxu1 %v904_v22 }
  0x68   :  { %1917 = vmatprep.subr.bf16.mxu1 %v2337_v18 }
  0x6b   :  { %1919 = vmatpush3.bf16.msra.mxu1 %v2344_v19 }
  0x6c   :  { %1921 = vmatprep.subr.bf16.mxu1 %v2349_v20 }
  0x6f   :  { %1923 = vmatpush3.bf16.msra.mxu1 %v2356_v21 }
  0x70   :  { %1925 = vmatprep.subr.bf16.mxu1 %v2362_v23 }
  0x73   :  { %1927 = vmatpush3.bf16.msra.mxu1 %v2369_v24 }
  0x74   :  { %1929 = vmatprep.subr.bf16.mxu1 %v2374_v25 }
  0x77   :  { %1931 = vmatpush3.bf16.msra.mxu1 %v2381_v26 }
  0x78   :  { %1933 = vmatprep.subr.bf16.mxu1 %v2386_v27 }
  0x7b   :  { %1935 = vmatpush3.bf16.msra.mxu1 %v2393_v28 }
  0x7c   :  { %1937 = vmatprep.subr.bf16.mxu1 %v2398_v30 }
  0x7f   :  { %1939 = vmatpush3.bf16.msra.mxu1 %v2405_v31 }
  0x80   :  { %1941 = vmatprep.subr.bf16.mxu1 %v2410_v32 }
  0x83   :  { %1943 = vmatpush3.bf16.msra.mxu1 %v2417_v33 }
  0x86   :  { %972 = vmatmul.mubr.f32.vlgmr.msra.gmra.mrb[6].mxu1 %v903_v34 }
  0xe7   :  { %v2421_v35 = vpop.f32.mrb[0].mxu0 }
  0xe8   :  { %v187_v36 = vpop.f32.mrb[1].mxu0  ;;  %v190_v37 = vsub.f32 %v2421_v35, %v2130_v44  ;;  %v550_v45 = vrot.slane %v2421_v35, 2 }
  0xe9   :  { %400 = vmatprep.mubr.f32.mxu0 %v187_v36  ;;  %v551_v38 = vrot.slane %v187_v36, 2  ;;  %v191_v39 = vsub.f32 %v187_v36, %v2085_v29 }
  0xea   :  { %401 = vmatmul.mubr.f32.vlgmr.msra.gmra.mrb[2].mxu0 %v2421_v35  ;;  %v192_v40 = vmul.f32 %v190_v37, %v190_v37 }
  0xeb   :  { %1819 = vmatpush3.bf16.msra.mxu0 %v2136_v46  ;;  %618 = vmatprep.mubr.f32.mxu0 %v551_v38  ;;  %v193_v41 = vmul.f32 %v191_v39, %v191_v39  ;;  %v765_v46 = vrot.slane %v187_v36, 4 }
  0xec   :  { %1821 = vmatprep.subr.bf16.mxu0 %v2141_v47  ;;  %v764_v47 = vrot.slane %v2421_v35, 4 }
  0xed   :  { %v194_v42 = vadd.f32 %v193_v41, %v192_v40 }
  0xef   :  { %1823 = vmatpush3.bf16.msra.mxu0 %v2149_v48  ;;  %195 = vadd.xlane.f32.xlu0 %v194_v42  ;;  %v979_v48 = vrot.slane %v187_v36, 6 }
  0xf0   :  { %1825 = vmatprep.subr.bf16.mxu0 %v2154_v49  ;;  %v199_v49 = vld [vmem:[%s2493_s4] sm:$0x3] }
  0xf3   :  { %1827 = vmatpush3.bf16.msra.mxu0 %v2161_v50 }
  0xf4   :  { %1829 = vmatprep.subr.bf16.mxu0 %v2166_v51 }
  0xf7   :  { %1831 = vmatpush3.bf16.msra.mxu0 %v2173_v52 }
  0xf8   :  { %1833 = vmatprep.subr.bf16.mxu0 %v2178_v53 }
  0xf9   :  { %v1456_v29 = vpop.f32.mrb[0].mxu1 }
  0xfa   :  { %v1457_v43 = vpop.f32.mrb[1].mxu1 }
  0xfb   :  { %1835 = vmatpush3.bf16.msra.mxu0 %v2185_v54  ;;  %v1458_v44 = vadd.f32 %v1457_v43, %v1456_v29 }
  0xfc   :  { %1837 = vmatprep.subr.bf16.mxu0 %v2190_v55 }
  0xfd   :  { %v335_v50 = vadd.f32 %v1458_v44, %v199_v49 }
  0xff   :  { %1839 = vmatpush3.bf16.msra.mxu0 %v2197_v56 }
 0x100   :  { %1841 = vmatprep.subr.bf16.mxu0 %v2202_v57 }
 0x103   :  { %1843 = vmatpush3.bf16.msra.mxu0 %v2209_v58 }
 0x104   :  { %1845 = vmatprep.subr.bf16.mxu0 %v2214_v59  ;;  %v978_v59 = vrot.slane %v2421_v35, 6 }
 0x107   :  { %1847 = vmatpush3.bf16.msra.mxu0 %v2221_v60 }
 0x108   :  { %1881 = vmatprep.subr.bf16.mxu0 %v2226_v61 }
 0x10a   :  { %619 = vmatmul.mubr.f32.vlgmr.msra.gmra.mrb[4].mxu0 %v550_v45 }
 0x10b   :  { %1883 = vmatpush3.bf16.msra.mxu0 %v2235_v0  ;;  %832 = vmatprep.mubr.f32.mxu0 %v765_v46 }
 0x10c   :  { %1885 = vmatprep.subr.bf16.mxu0 %v2240_v1 }
 0x10f   :  { %1887 = vmatpush3.bf16.msra.mxu0 %v2247_v2 }
 0x110   :  { %1889 = vmatprep.subr.bf16.mxu0 %v2252_v3 }
 0x113   :  { %1891 = vmatpush3.bf16.msra.mxu0 %v2259_v4  ;;  %v200_v4 = vld [vmem:[%s2494_s5] sm:$0x3] }
 0x114   :  { %1893 = vmatprep.subr.bf16.mxu0 %v2264_v5 }
 0x117   :  { %1895 = vmatpush3.bf16.msra.mxu0 %v2271_v6 }
 0x118   :  { %1897 = vmatprep.subr.bf16.mxu0 %v2276_v7 }
 0x119   :  { %v1526_v51 = vpop.f32.mrb[2].mxu1 }
 0x11a   :  { %v1527_v52 = vpop.f32.mrb[3].mxu1 }
 0x11b   :  { %1899 = vmatpush3.bf16.msra.mxu0 %v2283_v8  ;;  %v1528_v53 = vadd.f32 %v1527_v52, %v1526_v51 }
 0x11c   :  { %1901 = vmatprep.subr.bf16.mxu0 %v2288_v9 }
 0x11d   :  { %v547_v56 = vadd.f32 %v1528_v53, %v335_v50 }
 0x11f   :  { %1903 = vmatpush3.bf16.msra.mxu0 %v2295_v10 }
 0x120   :  { %1905 = vmatprep.subr.bf16.mxu0 %v2300_v11 }
 0x123   :  { %1907 = vmatpush3.bf16.msra.mxu0 %v2307_v12 }
 0x124   :  { %1909 = vmatprep.subr.bf16.mxu0 %v2312_v13 }
 0x127   :  { %1911 = vmatpush3.bf16.msra.mxu0 %v2319_v14 }
 0x128   :  { %1945 = vmatprep.subr.bf16.mxu0 %v2324_v15 }
 0x12a   :  { %833 = vmatmul.mubr.f32.vlgmr.msra.gmra.mrb[6].mxu0 %v764_v47 }
 0x12b   :  { %1947 = vmatpush3.bf16.msra.mxu0 %v2332_v17  ;;  %1046 = vmatprep.mubr.f32.mxu0 %v979_v48 }
 0x12c   :  { %1949 = vmatprep.subr.bf16.mxu0 %v2337_v18 }
 0x12f   :  { %1951 = vmatpush3.bf16.msra.mxu0 %v2344_v19 }
 0x130   :  { %1953 = vmatprep.subr.bf16.mxu0 %v2349_v20 }
 0x133   :  { %1955 = vmatpush3.bf16.msra.mxu0 %v2356_v21 }
 0x134   :  { %1957 = vmatprep.subr.bf16.mxu0 %v2362_v23 }
 0x137   :  { %1959 = vmatpush3.bf16.msra.mxu0 %v2369_v24 }
 0x138   :  { %1961 = vmatprep.subr.bf16.mxu0 %v2374_v25 }
 0x139   :  { %v1596_v54 = vpop.f32.mrb[4].mxu1 }
 0x13a   :  { %v1597_v55 = vpop.f32.mrb[5].mxu1 }
 0x13b   :  { %1963 = vmatpush3.bf16.msra.mxu0 %v2381_v26  ;;  %v1598_v57 = vadd.f32 %v1597_v55, %v1596_v54 }
 0x13c   :  { %1965 = vmatprep.subr.bf16.mxu0 %v2386_v27 }
 0x13d   :  { %v763_v58 = vadd.f32 %v1598_v57, %v547_v56 }
 0x13f   :  { %1967 = vmatpush3.bf16.msra.mxu0 %v2393_v28 }
 0x140   :  { %1969 = vmatprep.subr.bf16.mxu0 %v2398_v30 }
 0x143   :  { %1971 = vmatpush3.bf16.msra.mxu0 %v2405_v31 }
 0x144   :  { %1973 = vmatprep.subr.bf16.mxu0 %v2410_v32 }
 0x147   :  { %1975 = vmatpush3.bf16.msra.mxu0 %v2417_v33 }
 0x14a   :  { %1047 = vmatmul.mubr.f32.vlgmr.msra.gmra.mrb[8].mxu0 %v978_v59 }
 0x159   :  { %v1666_v60 = vpop.f32.mrb[6].mxu1 }
 0x15a   :  { %v1667_v61 = vpop.f32.mrb[7].mxu1 }
 0x15b   :  { %v1668_v62 = vadd.f32 %v1667_v61, %v1666_v60 }
 0x15d   :  { %v977_v63 = vadd.f32 %v1668_v62, %v763_v58 }
 0x15f   :  { %1053 = vst [vmem:[%s2493_s4] sm:$0x3] %v977_v63 }
 0x17c   :  { %v196_v0 = vpop.xlane.xlu0 %195 }
 0x17d   :  { %198 = vst.msk [vmem:[%s2498_s6] sm:$0xff] %vm197_vm1, %v196_v0 }
 0x1bd   :  { %v1491_v1 = vpop.f32.mrb[2].mxu0 }
 0x1be   :  { %v1492_v2 = vpop.f32.mrb[3].mxu0 }
 0x1bf   :  { %v1493_v3 = vadd.f32 %v1492_v2, %v1491_v1 }
 0x1c1   :  { %v406_v7 = vadd.f32 %v1493_v3, %v200_v4 }
 0x1dd   :  { %v1561_v5 = vpop.f32.mrb[4].mxu0 }
 0x1de   :  { %v1562_v6 = vpop.f32.mrb[5].mxu0 }
 0x1df   :  { %v1563_v8 = vadd.f32 %v1562_v6, %v1561_v5 }
 0x1e1   :  { %v624_v9 = vadd.f32 %v1563_v8, %v406_v7 }
 0x1fd   :  { %v1631_v10 = vpop.f32.mrb[6].mxu0 }
 0x1fe   :  { %v1632_v11 = vpop.f32.mrb[7].mxu0 }
 0x1ff   :  { %v1633_v12 = vadd.f32 %v1632_v11, %v1631_v10 }
 0x201   :  { %v838_v13 = vadd.f32 %v1633_v12, %v624_v9 }
 0x21d   :  { %v1701_v14 = vpop.f32.mrb[8].mxu0 }
 0x21e   :  { %v1702_v15 = vpop.f32.mrb[9].mxu0 }
 0x21f   :  { %v1703_v16 = vadd.f32 %v1702_v15, %v1701_v14 }
 0x221   :  { %v1052_v17 = vadd.f32 %v1703_v16, %v838_v13 }
 0x223   :  { %1054 = vst [vmem:[%s2494_s5] sm:$0x3] %v1052_v17 }

</bundles_post_ra>
